<compile_context>
chip_gen: v6e
topology: v6e:2x2x1
jax: 0.10.0
libtpu: 0.0.40
codegen_flags: <defaults>
</compile_context>

<pallas_src>
import jax
import jax.numpy as jnp
from jax.experimental import pallas as pl
from jax.experimental.pallas import tpu as pltpu


_LANE = 128      # vreg lane width (last dim)
_SUBLANE = 8     # vreg sublane width (second-to-last dim)


def _round_up(n, m):
    return ((n + m - 1) // m) * m


def _mlp_hooked_kernel(x_ref, w1_ref, b1_ref, w2_ref, b2_ref, out_ref, hid_ref):
    # One batch tile: matmul -> bias -> relu -> matmul -> bias on MXU/VPU.
    x = x_ref[...]                                            # (TB, D_in_p)
    h = jnp.dot(x, w1_ref[...], preferred_element_type=jnp.float32)
    h = h + b1_ref[...]                                       # broadcast (1, H_p), f32
    h = jnp.maximum(h, 0.0)                                   # ReLU ("act" output)
    h_c = h.astype(hid_ref.dtype)                             # single cast
    hid_ref[...] = h_c                                        # hooked intermediate
    o = jnp.dot(h_c, w2_ref[...], preferred_element_type=jnp.float32)
    o = o + b2_ref[...]                                       # broadcast (1, D_out_p), f32
    out_ref[...] = o.astype(out_ref.dtype)


def model_with_hook_auto(x, w1, b1, w2, b2, *, block_b=512):
    """Pallas forward of ModelWithHookAuto over a 2-layer MLP.

    Returns (out, selected_out) exactly like the hooked torch module:
        selected_out = relu(x @ w1 + b1); out = selected_out @ w2 + b2
    Weights are pre-transposed to (in_features, out_features).
    """
    B, D_in = x.shape
    H = w1.shape[1]
    D_out = w2.shape[1]
    dtype = x.dtype
    bytes_per = jnp.dtype(dtype).itemsize

    # ---- Lane-dense feature dims (multiples of 128) ------------------------
    D_in_p = _round_up(D_in, _LANE)
    H_p = _round_up(H, _LANE)
    D_out_p = _round_up(D_out, _LANE)

    # ---- Batch tile: as large as possible within a conservative VMEM budget.
    tb = _round_up(min(block_b, _round_up(B, _SUBLANE)), _SUBLANE)

    def _vmem_bytes(t):
        # double-buffered x/hid/out tiles + resident W1/W2/b1/b2
        act = 2 * t * (D_in_p + H_p + D_out_p) * bytes_per
        wts = (D_in_p * H_p + H_p * D_out_p + H_p + D_out_p) * bytes_per
        return act + wts

    vmem_budget = 48 * 1024 * 1024   # safe for v7x (64 MiB) as well as v5e/v6e
    while tb > _SUBLANE and _vmem_bytes(tb) > vmem_budget:
        tb = _round_up(tb // 2, _SUBLANE)

    B_p = _round_up(B, tb)
    n_blocks = B_p // tb

    # ---- Zero padding keeps the math exact (padded cols of b/W are zero,
    #      relu(0) = 0, zero rows of W2 contribute nothing); sliced off below.
    x_p = jnp.pad(x, ((0, B_p - B), (0, D_in_p - D_in)))
    w1_p = jnp.pad(w1, ((0, D_in_p - D_in), (0, H_p - H)))
    b1_p = jnp.pad(b1.reshape(1, H), ((0, 0), (0, H_p - H)))
    w2_p = jnp.pad(w2, ((0, H_p - H), (0, D_out_p - D_out)))
    b2_p = jnp.pad(b2.reshape(1, D_out), ((0, 0), (0, D_out_p - D_out)))

    flops = 2 * B_p * (D_in_p * H_p + H_p * D_out_p)
    bytes_accessed = (
        x_p.size + w1_p.size + b1_p.size + w2_p.size + b2_p.size
        + B_p * (H_p + D_out_p)
    ) * bytes_per

    out_p, hid_p = pl.pallas_call(
        _mlp_hooked_kernel,
        out_shape=(
            jax.ShapeDtypeStruct((B_p, D_out_p), dtype),
            jax.ShapeDtypeStruct((B_p, H_p), dtype),
        ),
        grid=(n_blocks,),
        in_specs=[
            pl.BlockSpec((tb, D_in_p), lambda i: (i, 0)),     # x: batch-tiled
            pl.BlockSpec((D_in_p, H_p), lambda i: (0, 0)),    # W1: VMEM-resident
            pl.BlockSpec((1, H_p), lambda i: (0, 0)),         # b1: VMEM-resident
            pl.BlockSpec((H_p, D_out_p), lambda i: (0, 0)),   # W2: VMEM-resident
            pl.BlockSpec((1, D_out_p), lambda i: (0, 0)),     # b2: VMEM-resident
        ],
        out_specs=(
            pl.BlockSpec((tb, D_out_p), lambda i: (i, 0)),    # out: batch-tiled
            pl.BlockSpec((tb, H_p), lambda i: (i, 0)),        # hooked: batch-tiled
        ),
        compiler_params=pltpu.CompilerParams(
            dimension_semantics=("parallel",),
            vmem_limit_bytes=64 * 1024 * 1024,
        ),
        cost_estimate=pl.CostEstimate(
            flops=flops, transcendentals=0, bytes_accessed=bytes_accessed),
    )(x_p, w1_p, b1_p, w2_p, b2_p)

    # Strip padding; forward() returns (out, selected_out).
    return out_p[:B, :D_out], hid_p[:B, :H]


if __name__ == "__main__":
    key = jax.random.PRNGKey(0)
    k_x, k_w1, k_b1, k_w2, k_b2 = jax.random.split(key, 5)

    B, D_in, H, D_out = 8, 32, 64, 16
    x = jax.random.normal(k_x, (B, D_in), dtype=jnp.float32)
    # Deterministic synthetic parameters (Linear weights pre-transposed to (in, out)).
    w1 = jax.random.normal(k_w1, (D_in, H), dtype=jnp.float32) * 0.1
    b1 = jax.random.normal(k_b1, (H,), dtype=jnp.float32) * 0.1
    w2 = jax.random.normal(k_w2, (H, D_out), dtype=jnp.float32) * 0.1
    b2 = jax.random.normal(k_b2, (D_out,), dtype=jnp.float32) * 0.1

    out, selected_out = model_with_hook_auto(x, w1, b1, w2, b2)
    jax.block_until_ready((out, selected_out))

    # Reference check in plain JAX (same math as the hooked torch MLP).
    hid_ref = jnp.maximum(x @ w1 + b1, 0.0)
    out_ref = hid_ref @ w2 + b2
    assert out.shape == (B, D_out) and selected_out.shape == (B, H)
    assert jnp.allclose(out, out_ref, atol=1e-5), "final output mismatch"
    assert jnp.allclose(selected_out, hid_ref, atol=1e-5), "hooked output mismatch"

    print("KERNEL_OK")
</pallas_src>

<mosaic_0001>
module attributes {stable_mosaic.version = 11 : i64} {
  func.func @_mlp_hooked_kernel(%arg0: i32, %arg1: memref<8x128xf32, #tpu.memory_space<vmem>>, %arg2: memref<128x128xf32, #tpu.memory_space<vmem>>, %arg3: memref<1x128xf32, #tpu.memory_space<vmem>>, %arg4: memref<128x128xf32, #tpu.memory_space<vmem>>, %arg5: memref<1x128xf32, #tpu.memory_space<vmem>>, %arg6: memref<8x128xf32, #tpu.memory_space<vmem>>, %arg7: memref<8x128xf32, #tpu.memory_space<vmem>>) attributes {dimension_semantics = [#tpu.dimension_semantics<parallel>], iteration_bounds = array<i64: 1>, scalar_prefetch = 0 : i64, scratch_operands = 0 : i64, tpu.core_type = #tpu.core_type<tc>, window_params = [{transform_indices = @transform_0, window_bounds = array<i64: 8, 128>}, {pipeline_mode = #tpu.pipeline_mode<synchronous>, transform_indices = @transform_1, window_bounds = array<i64: 128, 128>}, {pipeline_mode = #tpu.pipeline_mode<synchronous>, transform_indices = @transform_2, window_bounds = array<i64: 1, 128>}, {pipeline_mode = #tpu.pipeline_mode<synchronous>, transform_indices = @transform_3, window_bounds = array<i64: 128, 128>}, {pipeline_mode = #tpu.pipeline_mode<synchronous>, transform_indices = @transform_4, window_bounds = array<i64: 1, 128>}, {transform_indices = @transform_5, window_bounds = array<i64: 8, 128>}, {transform_indices = @transform_6, window_bounds = array<i64: 8, 128>}]} {
    %c0 = arith.constant 0 : index
    %c0_0 = arith.constant 0 : index
    %0 = vector.load %arg1[%c0, %c0_0] : memref<8x128xf32, #tpu.memory_space<vmem>>, vector<8x128xf32>
    %c0_1 = arith.constant 0 : index
    %c0_2 = arith.constant 0 : index
    %1 = vector.load %arg2[%c0_1, %c0_2] : memref<128x128xf32, #tpu.memory_space<vmem>>, vector<128x128xf32>
    %cst = arith.constant dense<0.000000e+00> : vector<8x128xf32>
    %2 = tpu.matmul %0, %1, %cst {dimension_numbers = #tpu.dot_dimension_numbers<[1], [0], [0], [1], [0, 0, 1, 1], [], []>} : vector<8x128xf32>, vector<128x128xf32>, vector<8x128xf32> -> vector<8x128xf32>
    %c0_3 = arith.constant 0 : index
    %c0_4 = arith.constant 0 : index
    %3 = vector.load %arg3[%c0_3, %c0_4] : memref<1x128xf32, #tpu.memory_space<vmem>>, vector<1x128xf32>
    %4 = vector.broadcast %3 : vector<1x128xf32> to vector<8x128xf32>
    %5 = arith.addf %2, %4 : vector<8x128xf32>
    %cst_5 = arith.constant 0.000000e+00 : f32
    %6 = vector.broadcast %cst_5 : f32 to vector<8x128xf32>
    %7 = arith.maximumf %5, %6 : vector<8x128xf32>
    %c0_6 = arith.constant 0 : index
    %c0_7 = arith.constant 0 : index
    %8 = vector.load %arg7[%c0_6, %c0_7] : memref<8x128xf32, #tpu.memory_space<vmem>>, vector<8x128xf32>
    tpu.vector_store %arg7[%c0_6, %c0_7], %7 {strides = array<i32>} : memref<8x128xf32, #tpu.memory_space<vmem>>, vector<8x128xf32>,
    %c0_8 = arith.constant 0 : index
    %c0_9 = arith.constant 0 : index
    %9 = vector.load %arg4[%c0_8, %c0_9] : memref<128x128xf32, #tpu.memory_space<vmem>>, vector<128x128xf32>
    %cst_10 = arith.constant dense<0.000000e+00> : vector<8x128xf32>
    %10 = tpu.matmul %7, %9, %cst_10 {dimension_numbers = #tpu.dot_dimension_numbers<[1], [0], [0], [1], [0, 0, 1, 1], [], []>} : vector<8x128xf32>, vector<128x128xf32>, vector<8x128xf32> -> vector<8x128xf32>
    %c0_11 = arith.constant 0 : index
    %c0_12 = arith.constant 0 : index
    %11 = vector.load %arg5[%c0_11, %c0_12] : memref<1x128xf32, #tpu.memory_space<vmem>>, vector<1x128xf32>
    %12 = vector.broadcast %11 : vector<1x128xf32> to vector<8x128xf32>
    %13 = arith.addf %10, %12 : vector<8x128xf32>
    %c0_13 = arith.constant 0 : index
    %c0_14 = arith.constant 0 : index
    %14 = vector.load %arg6[%c0_13, %c0_14] : memref<8x128xf32, #tpu.memory_space<vmem>>, vector<8x128xf32>
    tpu.vector_store %arg6[%c0_13, %c0_14], %13 {strides = array<i32>} : memref<8x128xf32, #tpu.memory_space<vmem>>, vector<8x128xf32>,
    return
  }
  func.func @transform_0(%arg0: i32) -> (i32, i32) {
    %c0_i32 = arith.constant 0 : i32
    %c0_i32_0 = arith.constant 0 : i32
    return %arg0, %c0_i32 : i32, i32
  }
  func.func @transform_1(%arg0: i32) -> (i32, i32) {
    %c0_i32 = arith.constant 0 : i32
    %c0_i32_0 = arith.constant 0 : i32
    %c0_i32_1 = arith.constant 0 : i32
    return %c0_i32, %c0_i32_0 : i32, i32
  }
  func.func @transform_2(%arg0: i32) -> (i32, i32) {
    %c0_i32 = arith.constant 0 : i32
    %c0_i32_0 = arith.constant 0 : i32
    %c0_i32_1 = arith.constant 0 : i32
    return %c0_i32, %c0_i32_0 : i32, i32
  }
  func.func @transform_3(%arg0: i32) -> (i32, i32) {
    %c0_i32 = arith.constant 0 : i32
    %c0_i32_0 = arith.constant 0 : i32
    %c0_i32_1 = arith.constant 0 : i32
    return %c0_i32, %c0_i32_0 : i32, i32
  }
  func.func @transform_4(%arg0: i32) -> (i32, i32) {
    %c0_i32 = arith.constant 0 : i32
    %c0_i32_0 = arith.constant 0 : i32
    %c0_i32_1 = arith.constant 0 : i32
    return %c0_i32, %c0_i32_0 : i32, i32
  }
  func.func @transform_5(%arg0: i32) -> (i32, i32) {
    %c0_i32 = arith.constant 0 : i32
    %c0_i32_0 = arith.constant 0 : i32
    return %arg0, %c0_i32 : i32, i32
  }
  func.func @transform_6(%arg0: i32) -> (i32, i32) {
    %c0_i32 = arith.constant 0 : i32
    %c0_i32_0 = arith.constant 0 : i32
    return %arg0, %c0_i32 : i32, i32
  }
}

</mosaic_0001>

<bundles_post_ra>
// kernel: tpu_custom_call.1
= control target key start
LH: loop header
LB: loop body
LE: loop exit
PB: predicated region body
PF: predicated region fallthrough
CT: control target
= control target key end

     0   :  { %12 = vsyncpa [#allocation3], 0  ;;  %s605_s0 = inlined_call_operand.hbm [shape: f32[8,128], index: 0, kind: input, shape index: {}]   ;;  %s606_s1 = inlined_call_operand.hbm [shape: f32[128,128], index: 1, kind: input, shape index: {}]   ;;  %s607_s2 = inlined_call_operand.vmem [shape: f32[1,128], index: 2, kind: input, shape index: {}]   ;;  %s608_s3 = inlined_call_operand.hbm [shape: f32[128,128], index: 3, kind: input, shape index: {}]   ;;  %s609_s4 = inlined_call_operand.vmem [shape: f32[1,128], index: 4, kind: input, shape index: {}]   ;;  %s610_s5 = inlined_call_operand.hbm [shape: f32[8,128], index: 5, kind: output, shape index: {0}]   ;;  %s611_s6 = inlined_call_operand.hbm [shape: f32[8,128], index: 6, kind: output, shape index: {1}]  }
   0x1   :  { %13 = vsyncpa [#allocation6], 0 }
   0x2   :  { %14 = vsyncpa [#allocation4], 0 }
   0x3   :  { %15 = vsyncpa [#allocation10], 0  ;;  %s506_s21 = smov [#allocation5]  }
   0x4   :  { %s31_s22 = sshll.u32 %s506_s21, 4  ;;  %s32_s22 = int_to_ptr.vmem [resolvable:$true] %s31_s22 }
   0x5   :  { %s406_s23 = scalar_lea.vmem %s32_s22, 2048  ;;  %p411_p1 = scmp.lt.s32.totalorder %s32_s22, %s32_s22 }
   0x6   :  { %p407_p0 = scmp.ne.s32.totalorder %s32_s22, %s406_s23  ;;  %p412_p2 = scmp.lt.s32.totalorder %s406_s23, %s406_s23 }
   0x8   :  { %p413_p3 = por %p412_p2, %p411_p1 }
   0xa   :  { %p414_p4 = pnand %p413_p3, %p407_p0 }
   0xc   :  { %417 = shalt.err (!%p414_p4)
}
   0xd   :  { %s507_s24 = smov 128   ;;  %s508_s25 = smov 8  }
   0xe   :  { %37 = dma.hbm_to_vmem [thread:$0]  %s606_s1, 2048, %s32_s22, [#allocation6], %s507_s24, %s507_s24, %s508_s25  }
   0xf   :  { %s509_s28 = smov [#allocation2]   ;;  %s510_s30 = smov [#allocation7]  }
  0x10   :  { %s22_s29 = sshll.u32 %s509_s28, 4  ;;  %s45_s7 = sshll.u32 %s510_s30, 4  ;;  %s23_s29 = int_to_ptr.vmem [resolvable:$true] %s22_s29  ;;  %s46_s7 = int_to_ptr.vmem [resolvable:$true] %s45_s7 }
  0x11   :  { %s426_s8 = scalar_lea.vmem %s23_s29, 128  ;;  %p431_p6 = scmp.lt.s32.totalorder %s23_s29, %s23_s29 }
  0x12   :  { %p427_p5 = scmp.ne.s32.totalorder %s23_s29, %s426_s8  ;;  %p432_p7 = scmp.lt.s32.totalorder %s426_s8, %s426_s8 }
  0x14   :  { %p433_p8 = por %p432_p7, %p431_p6 }
  0x16   :  { %p434_p9 = pnand %p433_p8, %p427_p5 }
  0x18   :  { %437 = shalt.err (!%p434_p9)
}
  0x19   :  { %25 = dma.hbm_to_vmem [thread:$0]  %s605_s0, 128, %s23_s29, [#allocation3]  }
  0x1a   :  { %s446_s11 = scalar_lea.vmem %s46_s7, 2048  ;;  %p451_p11 = scmp.lt.s32.totalorder %s46_s7, %s46_s7 }
  0x1b   :  { %p447_p10 = scmp.ne.s32.totalorder %s46_s7, %s446_s11  ;;  %p452_p12 = scmp.lt.s32.totalorder %s446_s11, %s446_s11 }
  0x1d   :  { %p453_p13 = por %p452_p12, %p451_p11 }
  0x1f   :  { %p454_p0 = pnand %p453_p13, %p447_p10 }
  0x21   :  { %457 = shalt.err (!%p454_p0)
}
  0x22   :  { %51 = dma.hbm_to_vmem [thread:$0]  %s608_s3, 2048, %s46_s7, [#allocation6], %s507_s24, %s507_s24, %s508_s25  }
  0x23   :  { %498 = dma.done.wait [#allocation3], 128  }
  0x24   :  { %499 = vsyncadd [#allocation3], 4294967168 }
  0x25   :  { %500 = dma.done.wait [#allocation6], 4096  }
  0x26   :  { %501 = vsyncadd [#allocation6], 4294963200  ;;  %v511_v0 = vmov 0.0   ;;  %vm512_vm0 = vmmov 0   ;;  %v79_v1 = vld [vmem:[#allocation5 + $0x78] sm:$0xff]  ;;  %v78_v2 = vld [vmem:[#allocation5 + $0x70] sm:$0xff] }
  0x27   :  { %319 = vmatprep.subr.mxu0 %v511_v0  ;;  %351 = vmatprep.mubr.msk.f32.mxu0 %vm512_vm0, %v511_v0  ;;  %v77_v3 = vld [vmem:[#allocation5 + $0x68] sm:$0xff]  ;;  %v76_v4 = vld [vmem:[#allocation5 + $0x60] sm:$0xff]  ;;  %v174_v5 = vld [vmem:[#allocation7 + $0x78] sm:$0xff]  ;;  %s513_s13 = smov [#allocation9]  }
  0x28   :  { %354 = vmatprep.subr.mxu1 %v511_v0  ;;  %386 = vmatprep.mubr.msk.f32.mxu1 %vm512_vm0, %v511_v0  ;;  %v75_v6 = vld [vmem:[#allocation5 + $0x58] sm:$0xff]  ;;  %v173_v7 = vld [vmem:[#allocation7 + $0x70] sm:$0xff]  ;;  %v172_v8 = vld [vmem:[#allocation7 + $0x68] sm:$0xff]  ;;  %s269_s14 = sshll.u32 %s513_s13, 4  ;;  %s270_s14 = int_to_ptr.vmem [resolvable:$true] %s269_s14 }
  0x29   :  { %320 = vmatpush3.msra.mxu0 %v79_v1  ;;  %355 = vmatpush3.msra.mxu1 %v174_v5  ;;  %v74_v9 = vld [vmem:[#allocation5 + $0x50] sm:$0xff]  ;;  %v171_v10 = vld [vmem:[#allocation7 + $0x60] sm:$0xff]  ;;  %v73_v11 = vld [vmem:[#allocation5 + $0x48] sm:$0xff]  ;;  %s458_s15 = scalar_lea.vmem %s270_s14, 128  ;;  %p463_p2 = scmp.lt.s32.totalorder %s270_s14, %s270_s14 }
  0x2a   :  { %321 = vmatprep.subr.mxu0 %v511_v0  ;;  %356 = vmatprep.subr.mxu1 %v511_v0  ;;  %v170_v12 = vld [vmem:[#allocation7 + $0x58] sm:$0xff]  ;;  %v72_v13 = vld [vmem:[#allocation5 + $0x40] sm:$0xff]  ;;  %v169_v14 = vld [vmem:[#allocation7 + $0x50] sm:$0xff]  ;;  %p459_p1 = scmp.ne.s32.totalorder %s270_s14, %s458_s15  ;;  %p464_p3 = scmp.lt.s32.totalorder %s458_s15, %s458_s15 }
  0x2b   :  { %322 = vmatpush3.msra.mxu0 %v78_v2  ;;  %357 = vmatpush3.msra.mxu1 %v173_v7  ;;  %v71_v15 = vld [vmem:[#allocation5 + $0x38] sm:$0xff]  ;;  %v168_v16 = vld [vmem:[#allocation7 + $0x48] sm:$0xff]  ;;  %v70_v17 = vld [vmem:[#allocation5 + $0x30] sm:$0xff] }
  0x2c   :  { %323 = vmatprep.subr.mxu0 %v511_v0  ;;  %358 = vmatprep.subr.mxu1 %v511_v0  ;;  %v167_v18 = vld [vmem:[#allocation7 + $0x40] sm:$0xff]  ;;  %v69_v19 = vld [vmem:[#allocation5 + $0x28] sm:$0xff]  ;;  %v166_v20 = vld [vmem:[#allocation7 + $0x38] sm:$0xff]  ;;  %p465_p4 = por %p464_p3, %p463_p2 }
  0x2d   :  { %324 = vmatpush3.msra.mxu0 %v77_v3  ;;  %359 = vmatpush3.msra.mxu1 %v172_v8  ;;  %v68_v21 = vld [vmem:[#allocation5 + $0x20] sm:$0xff]  ;;  %v165_v22 = vld [vmem:[#allocation7 + $0x30] sm:$0xff]  ;;  %v67_v23 = vld [vmem:[#allocation5 + $0x18] sm:$0xff] }
  0x2e   :  { %325 = vmatprep.subr.mxu0 %v511_v0  ;;  %360 = vmatprep.subr.mxu1 %v511_v0  ;;  %v164_v24 = vld [vmem:[#allocation7 + $0x28] sm:$0xff]  ;;  %v66_v25 = vld [vmem:[#allocation5 + $0x10] sm:$0xff]  ;;  %v163_v26 = vld [vmem:[#allocation7 + $0x20] sm:$0xff]  ;;  %p466_p5 = pnand %p465_p4, %p459_p1 }
  0x2f   :  { %326 = vmatpush3.msra.mxu0 %v76_v4  ;;  %361 = vmatpush3.msra.mxu1 %v171_v10  ;;  %v65_v27 = vld [vmem:[#allocation5 + $0x8] sm:$0xff]  ;;  %v162_v28 = vld [vmem:[#allocation7 + $0x18] sm:$0xff]  ;;  %v64_v29 = vld [vmem:[#allocation5] sm:$0xff] }
  0x30   :  { %327 = vmatprep.subr.mxu0 %v511_v0  ;;  %362 = vmatprep.subr.mxu1 %v511_v0  ;;  %v63_v30 = vld [vmem:[#allocation2] sm:$0xff]  ;;  %v161_v31 = vld [vmem:[#allocation7 + $0x10] sm:$0xff]  ;;  %v160_v32 = vld [vmem:[#allocation7 + $0x8] sm:$0xff] }
  0x31   :  { %328 = vmatpush3.msra.mxu0 %v75_v6  ;;  %363 = vmatpush3.msra.mxu1 %v170_v12  ;;  %v159_v33 = vld [vmem:[#allocation7] sm:$0xff]  ;;  %v283_v34 = vld [vmem:[%s607_s2] ss:$0 sm:$0xff] }
  0x32   :  { %329 = vmatprep.subr.mxu0 %v511_v0  ;;  %364 = vmatprep.subr.mxu1 %v511_v0 }
  0x33   :  { %330 = vmatpush3.msra.mxu0 %v74_v9  ;;  %365 = vmatpush3.msra.mxu1 %v169_v14 }
  0x34   :  { %331 = vmatprep.subr.mxu0 %v511_v0  ;;  %366 = vmatprep.subr.mxu1 %v511_v0 }
  0x35   :  { %332 = vmatpush3.msra.mxu0 %v73_v11  ;;  %367 = vmatpush3.msra.mxu1 %v168_v16 }
  0x36   :  { %333 = vmatprep.subr.mxu0 %v511_v0  ;;  %368 = vmatprep.subr.mxu1 %v511_v0 }
  0x37   :  { %334 = vmatpush3.msra.mxu0 %v72_v13  ;;  %369 = vmatpush3.msra.mxu1 %v167_v18 }
  0x38   :  { %335 = vmatprep.subr.mxu0 %v511_v0  ;;  %370 = vmatprep.subr.mxu1 %v511_v0 }
  0x39   :  { %336 = vmatpush3.msra.mxu0 %v71_v15  ;;  %371 = vmatpush3.msra.mxu1 %v166_v20 }
  0x3a   :  { %337 = vmatprep.subr.mxu0 %v511_v0  ;;  %372 = vmatprep.subr.mxu1 %v511_v0 }
  0x3b   :  { %338 = vmatpush3.msra.mxu0 %v70_v17  ;;  %373 = vmatpush3.msra.mxu1 %v165_v22 }
  0x3c   :  { %339 = vmatprep.subr.mxu0 %v511_v0  ;;  %374 = vmatprep.subr.mxu1 %v511_v0 }
  0x3d   :  { %340 = vmatpush3.msra.mxu0 %v69_v19  ;;  %375 = vmatpush3.msra.mxu1 %v164_v24 }
  0x3e   :  { %341 = vmatprep.subr.mxu0 %v511_v0  ;;  %376 = vmatprep.subr.mxu1 %v511_v0 }
  0x3f   :  { %342 = vmatpush3.msra.mxu0 %v68_v21  ;;  %377 = vmatpush3.msra.mxu1 %v163_v26 }
  0x40   :  { %343 = vmatprep.subr.mxu0 %v511_v0  ;;  %378 = vmatprep.subr.mxu1 %v511_v0 }
  0x41   :  { %344 = vmatpush3.msra.mxu0 %v67_v23  ;;  %379 = vmatpush3.msra.mxu1 %v162_v28 }
  0x42   :  { %345 = vmatprep.subr.mxu0 %v511_v0  ;;  %380 = vmatprep.subr.mxu1 %v511_v0 }
  0x43   :  { %346 = vmatpush3.msra.mxu0 %v66_v25  ;;  %381 = vmatpush3.msra.mxu1 %v161_v31 }
  0x44   :  { %347 = vmatprep.subr.mxu0 %v511_v0  ;;  %382 = vmatprep.subr.mxu1 %v511_v0 }
  0x45   :  { %348 = vmatpush3.msra.mxu0 %v65_v27  ;;  %383 = vmatpush3.msra.mxu1 %v160_v32 }
  0x46   :  { %349 = vmatprep.subr.mxu0 %v511_v0  ;;  %384 = vmatprep.subr.mxu1 %v511_v0 }
  0x47   :  { %350 = vmatpush3.msra.mxu0 %v64_v29  ;;  %385 = vmatpush3.msra.mxu1 %v159_v33 }
  0x48   :  { %352 = vmatmul.mubr.f32.vlgmr.msra.gmra.mxu0 %v63_v30 }
 0x108   :  { %v153_v35 = vpop.f32.mrf.mxu0 }
 0x109   :  { %v154_v36 = vadd.f32 %v283_v34, %v153_v35 }
 0x10a   :  { %v353_v37 = vpop.f32.mrf.mxu0 }
 0x10b   :  { %v157_v38 = vmax.f32 %v154_v36, 0.0 }
 0x10d   :  { %158 = vst [vmem:[#allocation9] sm:$0xff] %v157_v38  ;;  %387 = vmatmul.mubr.f32.vlgmr.msra.gmra.mxu1 %v157_v38 }
 0x10e   :  { %469 = shalt.err (!%p466_p5)
}
 0x10f   :  { %272 = dma.vmem_to_hbm [thread:$0]  %s270_s14, 128, %s611_s6, [#allocation10]   ;;  %v284_v39 = vld [vmem:[%s609_s4] ss:$0 sm:$0xff] }
 0x110   :  { %s514_s19 = smov [#allocation8]  }
 0x111   :  { %s259_s20 = sshll.u32 %s514_s19, 4  ;;  %s260_s20 = int_to_ptr.vmem [resolvable:$true] %s259_s20 }
 0x112   :  { %s478_s21 = scalar_lea.vmem %s260_s20, 128  ;;  %p483_p7 = scmp.lt.s32.totalorder %s260_s20, %s260_s20 }
 0x113   :  { %p479_p6 = scmp.ne.s32.totalorder %s260_s20, %s478_s21  ;;  %p484_p8 = scmp.lt.s32.totalorder %s478_s21, %s478_s21 }
 0x115   :  { %p485_p9 = por %p484_p8, %p483_p7 }
 0x117   :  { %p486_p10 = pnand %p485_p9, %p479_p6 }
 0x1cd   :  { %v248_v40 = vpop.f32.mrf.mxu1 }
 0x1ce   :  { %v249_v41 = vadd.f32 %v284_v39, %v248_v40 }
 0x1cf   :  { %v388_v42 = vpop.f32.mrf.mxu1 }
 0x1d0   :  { %252 = vst [vmem:[#allocation8] sm:$0xff] %v249_v41 }
 0x1d1   :  { %489 = shalt.err (!%p486_p10)
}
 0x1d2   :  { %262 = dma.vmem_to_hbm [thread:$0]  %s260_s20, 128, %s610_s5, [#allocation4]  }
 0x1d3   :  { %502 = dma.done.wait [#allocation4], 128  }
 0x1d4   :  { %503 = vsyncadd [#allocation4], 4294967168 }
 0x1d5   :  { %504 = dma.done.wait [#allocation10], 128  }
 0x1d6   :  { %505 = vsyncadd [#allocation10], 4294967168 }
 0x1d7   :  { %279 = vsyncpa [#allocation3], 1 }
 0x1d8   :  { %280 = vsyncpa [#allocation6], 1 }
 0x1d9   :  { %281 = vsyncpa [#allocation4], 1 }
 0x1da   :  { %282 = vsyncpa [#allocation10], 1 }

</bundles_post_ra>
